<compile_context>
chip_gen: v5e
topology: v5e:2x2
jax: 0.10.0
libtpu: 0.0.40
codegen_flags: <defaults>
</compile_context>

<pallas_src>
import functools

import jax
import jax.numpy as jnp
from jax.experimental import pallas as pl
from jax.experimental.pallas import tpu as pltpu


def _kl_div_kernel(inp_ref, tgt_ref, out_ref, *, steps, tile_rows, rows):
    c = pl.program_id(0)   # chunk axis (TensorCore split on 2-TC chips)
    s = pl.program_id(1)   # reduction axis

    # Output block index depends only on c, so out_ref stays resident across
    # the reduction axis and acts as the accumulator.
    @pl.when(s == 0)
    def _init():
        out_ref[...] = jnp.zeros_like(out_ref)

    x = inp_ref[...]            # (tile_rows, lanes) f32 — log-probabilities
    t = tgt_ref[...]            # (tile_rows, lanes) f32 — probabilities
    lanes = x.shape[-1]

    block = c * steps + s       # logical block index (index_map clamps DMA)
    start = block * tile_rows
    is_full = start + tile_rows <= rows   # every row of this tile is valid

    def _accumulate(mask_rows):
        keep = t > 0
        if mask_rows:
            # Only the edge (or duplicated past-the-end) block pays for the
            # iota/compare mask; steady-state steps skip it entirely.
            row = jax.lax.broadcasted_iota(jnp.int32, (tile_rows, lanes), 0)
            keep = jnp.logical_and(keep, row < rows - start)
        # Guard log() so zero / out-of-bounds garbage target never reaches it;
        # the outer where discards anything produced in unselected lanes.
        safe_t = jnp.where(keep, t, jnp.float32(1.0))
        pw = jnp.where(keep, t * (jnp.log(safe_t) - x), jnp.float32(0.0))
        # (tile_rows, L) -> (tile_rows//8, 8, L); summing the leading dim is
        # pure element-wise vreg adds (VALU), no per-step cross-lane reduce.
        out_ref[...] += pw.reshape(-1, 8, lanes).sum(axis=0)

    @pl.when(is_full)
    def _steady():
        _accumulate(mask_rows=False)

    @pl.when(jnp.logical_not(is_full))
    def _edge():
        _accumulate(mask_rows=True)


def _tpu_config():
    """Return (two_tensorcores, vmem_capacity_bytes) with safe fallbacks."""
    kind = ""
    try:
        kind = jax.devices()[0].device_kind.lower()
    except Exception:
        pass
    two_tc = ("v7" in kind) or ("7x" in kind)
    vmem_cap = 64 * 1024 * 1024 if two_tc else 128 * 1024 * 1024
    try:
        vmem_cap = int(pltpu.get_tpu_info().vmem_capacity_bytes)
    except Exception:
        pass
    return two_tc, vmem_cap


def _pick_lanes(n):
    """Largest lane width in {512,256,128} dividing n; pad only if none does."""
    for lanes in (512, 256, 128):
        if n % lanes == 0:
            return lanes, 0
    # Rare fallback: minimal pad to the next multiple of 128 (one copy, only
    # when numel is not even 128-aligned).
    return 128, (-n) % 128


def kl_div_batchmean(inp, tgt):
    assert inp.shape == tgt.shape and inp.ndim == 3
    B = inp.shape[0]
    n = inp.size

    two_tc, vmem_cap = _tpu_config()
    big_vmem = vmem_cap >= 96 * 1024 * 1024

    lanes, pad = _pick_lanes(n)
    x = jnp.ravel(inp)
    t = jnp.ravel(tgt)
    if pad:
        # Padded target == 0 contributes exactly 0 to the sum.
        x = jnp.pad(x, (0, pad))
        t = jnp.pad(t, (0, pad))
    rows = (n + pad) // lanes
    x = x.reshape(rows, lanes)   # free bitcast reshape — no data movement
    t = t.reshape(rows, lanes)

    # Per-input tile bytes: ~8 MiB on 128-MiB-VMEM chips, ~4 MiB on 64-MiB.
    tile_bytes = (8 if big_vmem else 4) * 1024 * 1024
    tile_rows = max(8, (tile_bytes // (lanes * 4)) // 8 * 8)
    tile_rows = min(tile_rows, ((rows + 7) // 8) * 8)
    blocks_total = pl.cdiv(rows, tile_rows)
    vmem_limit = (48 if big_vmem else 32) * 1024 * 1024

    def _run(num_chunks, semantics):
        steps = pl.cdiv(blocks_total, num_chunks)

        def in_map(c, s):
            # Clamp so a duplicated past-the-end block never maps outside the
            # array; the kernel masks its contribution to zero.
            return (jnp.minimum(c * steps + s, blocks_total - 1), 0)

        kernel = functools.partial(
            _kl_div_kernel, steps=steps, tile_rows=tile_rows, rows=rows)

        cost = pl.CostEstimate(
            flops=5 * rows * lanes,
            transcendentals=rows * lanes,
            bytes_accessed=2 * rows * lanes * 4 + num_chunks * 8 * lanes * 4,
        )

        partials = pl.pallas_call(
            kernel,
            out_shape=jax.ShapeDtypeStruct((num_chunks * 8, lanes), jnp.float32),
            grid_spec=pltpu.PrefetchScalarGridSpec(
                num_scalar_prefetch=0,
                grid=(num_chunks, steps),
                in_specs=[
                    pl.BlockSpec((tile_rows, lanes), in_map),
                    pl.BlockSpec((tile_rows, lanes), in_map),
                ],
                out_specs=pl.BlockSpec((8, lanes), lambda c, s: (c, 0)),
            ),
            compiler_params=pltpu.CompilerParams(
                dimension_semantics=semantics,
                vmem_limit_bytes=vmem_limit,
            ),
            cost_estimate=cost,
        )(x, t)
        return jax.block_until_ready(partials)

    if two_tc:
        # v7x: split the stream across both TensorCores; fall back to the
        # proven single-chunk serial grid if CORE_PARALLEL is rejected.
        try:
            partials = _run(2, (pltpu.CORE_PARALLEL, pltpu.ARBITRARY))
        except Exception:
            partials = _run(1, ("arbitrary", "arbitrary"))
    else:
        partials = _run(1, ("arbitrary", "arbitrary"))

    # Single cross-lane/sublane reduce + batchmean division, done once in JAX.
    return jnp.sum(partials) / jnp.float32(B)


if __name__ == "__main__":
    key = jax.random.PRNGKey(0)
    k1, k2 = jax.random.split(key)
    B, S, D = 2, 8, 32

    # input is expected to be log-probabilities; target is probabilities.
    logits_in = jax.random.normal(k1, (B, S, D), dtype=jnp.float32)
    logits_tg = jax.random.normal(k2, (B, S, D), dtype=jnp.float32)
    inp = jax.nn.log_softmax(logits_in, axis=-1)
    tgt = jax.nn.softmax(logits_tg, axis=-1)

    loss = jax.block_until_ready(kl_div_batchmean(inp, tgt))

    # Reference check in plain JAX.
    ref_pw = jnp.where(tgt > 0, tgt * (jnp.log(tgt) - inp), 0.0)
    ref = jnp.sum(ref_pw) / B
    assert jnp.allclose(loss, ref, rtol=1e-5, atol=1e-6), (loss, ref)

    print("KERNEL_OK")
</pallas_src>

<mosaic_0001>
module attributes {stable_mosaic.version = 11 : i64} {
  func.func @_kl_div_kernel(%arg0: i32, %arg1: i32, %arg2: memref<8x512xf32, #tpu.memory_space<vmem>>, %arg3: memref<8x512xf32, #tpu.memory_space<vmem>>, %arg4: memref<8x512xf32, #tpu.memory_space<vmem>>) attributes {dimension_semantics = [#tpu.dimension_semantics<arbitrary>, #tpu.dimension_semantics<arbitrary>], iteration_bounds = array<i64: 1, 1>, scalar_prefetch = 0 : i64, scratch_operands = 0 : i64, tpu.core_type = #tpu.core_type<tc>, window_params = [{transform_indices = @transform_0, window_bounds = array<i64: 8, 512>}, {transform_indices = @transform_1, window_bounds = array<i64: 8, 512>}, {transform_indices = @transform_2, window_bounds = array<i64: 8, 512>}]} {
    %c0_i32 = arith.constant 0 : i32
    %0 = arith.cmpi eq, %arg1, %c0_i32 : i32
    %1 = arith.extui %0 : i1 to i32
    %c0_i32_0 = arith.constant 0 : i32
    %2 = arith.cmpi ne, %1, %c0_i32_0 : i32
    scf.if %2 {
      %cst = arith.constant 0.000000e+00 : f32
      %15 = vector.broadcast %cst : f32 to vector<8x512xf32>
      %c0_8 = arith.constant 0 : index
      %c0_9 = arith.constant 0 : index
      %16 = vector.load %arg4[%c0_8, %c0_9] : memref<8x512xf32, #tpu.memory_space<vmem>>, vector<8x512xf32>
      tpu.vector_store %arg4[%c0_8, %c0_9], %15 {strides = array<i32>} : memref<8x512xf32, #tpu.memory_space<vmem>>, vector<8x512xf32>,
    } else {
    }
    %c0 = arith.constant 0 : index
    %c0_1 = arith.constant 0 : index
    %3 = vector.load %arg2[%c0, %c0_1] : memref<8x512xf32, #tpu.memory_space<vmem>>, vector<8x512xf32>
    %c0_2 = arith.constant 0 : index
    %c0_3 = arith.constant 0 : index
    %4 = vector.load %arg3[%c0_2, %c0_3] : memref<8x512xf32, #tpu.memory_space<vmem>>, vector<8x512xf32>
    %c1_i32 = arith.constant 1 : i32
    %5 = arith.muli %arg0, %c1_i32 : i32
    %6 = arith.addi %5, %arg1 : i32
    %c8_i32 = arith.constant 8 : i32
    %7 = arith.muli %6, %c8_i32 : i32
    %c8_i32_4 = arith.constant 8 : i32
    %8 = arith.addi %7, %c8_i32_4 : i32
    %c1_i32_5 = arith.constant 1 : i32
    %9 = arith.cmpi sle, %8, %c1_i32_5 : i32
    %10 = arith.extui %9 : i1 to i32
    %c0_i32_6 = arith.constant 0 : i32
    %11 = arith.cmpi ne, %10, %c0_i32_6 : i32
    scf.if %11 {
      %cst = arith.constant 0.000000e+00 : f32
      %15 = vector.broadcast %cst : f32 to vector<8x512xf32>
      %16 = arith.cmpf ogt, %4, %15 : vector<8x512xf32>
      %cst_8 = arith.constant 1.000000e+00 : f32
      %17 = vector.broadcast %cst_8 : f32 to vector<8x512xf32>
      %18 = arith.select %16, %4, %17 : vector<8x512xi1>, vector<8x512xf32>
      %19 = math.log %18 : vector<8x512xf32>
      %20 = arith.subf %19, %3 : vector<8x512xf32>
      %21 = arith.mulf %4, %20 : vector<8x512xf32>
      %cst_9 = arith.constant 0.000000e+00 : f32
      %22 = vector.broadcast %cst_9 : f32 to vector<8x512xf32>
      %23 = arith.select %16, %21, %22 : vector<8x512xi1>, vector<8x512xf32>
      %c0_10 = arith.constant 0 : index
      %c0_11 = arith.constant 0 : index
      %24 = vector.load %arg4[%c0_10, %c0_11] : memref<8x512xf32, #tpu.memory_space<vmem>>, vector<8x512xf32>
      %25 = vector.shape_cast %23 : vector<8x512xf32> to vector<1x8x512xf32>
      %cst_12 = arith.constant dense<0.000000e+00> : vector<8x512xf32>
      %26 = vector.multi_reduction <add>, %25, %cst_12 [0] : vector<1x8x512xf32> to vector<8x512xf32>
      %27 = arith.addf %24, %26 : vector<8x512xf32>
      %c0_13 = arith.constant 0 : index
      %c0_14 = arith.constant 0 : index
      %28 = vector.load %arg4[%c0_13, %c0_14] : memref<8x512xf32, #tpu.memory_space<vmem>>, vector<8x512xf32>
      tpu.vector_store %arg4[%c0_13, %c0_14], %27 {strides = array<i32>} : memref<8x512xf32, #tpu.memory_space<vmem>>, vector<8x512xf32>,
    } else {
    }
    %true = arith.constant true
    %12 = arith.xori %9, %true : i1
    %13 = arith.extui %12 : i1 to i32
    %c0_i32_7 = arith.constant 0 : i32
    %14 = arith.cmpi ne, %13, %c0_i32_7 : i32
    scf.if %14 {
      %cst = arith.constant 0.000000e+00 : f32
      %15 = vector.broadcast %cst : f32 to vector<8x512xf32>
      %16 = arith.cmpf ogt, %4, %15 : vector<8x512xf32>
      %17 = tpu.iota {dimensions = array<i32: 0>} : vector<8x512xi32>
      %c1_i32_8 = arith.constant 1 : i32
      %18 = arith.subi %c1_i32_8, %7 : i32
      %19 = vector.broadcast %18 : i32 to vector<8x512xi32>
      %20 = arith.cmpi slt, %17, %19 : vector<8x512xi32>
      %21 = arith.andi %16, %20 : vector<8x512xi1>
      %cst_9 = arith.constant 1.000000e+00 : f32
      %22 = vector.broadcast %cst_9 : f32 to vector<8x512xf32>
      %23 = arith.select %21, %4, %22 : vector<8x512xi1>, vector<8x512xf32>
      %24 = math.log %23 : vector<8x512xf32>
      %25 = arith.subf %24, %3 : vector<8x512xf32>
      %26 = arith.mulf %4, %25 : vector<8x512xf32>
      %cst_10 = arith.constant 0.000000e+00 : f32
      %27 = vector.broadcast %cst_10 : f32 to vector<8x512xf32>
      %28 = arith.select %21, %26, %27 : vector<8x512xi1>, vector<8x512xf32>
      %c0_11 = arith.constant 0 : index
      %c0_12 = arith.constant 0 : index
      %29 = vector.load %arg4[%c0_11, %c0_12] : memref<8x512xf32, #tpu.memory_space<vmem>>, vector<8x512xf32>
      %30 = vector.shape_cast %28 : vector<8x512xf32> to vector<1x8x512xf32>
      %cst_13 = arith.constant dense<0.000000e+00> : vector<8x512xf32>
      %31 = vector.multi_reduction <add>, %30, %cst_13 [0] : vector<1x8x512xf32> to vector<8x512xf32>
      %32 = arith.addf %29, %31 : vector<8x512xf32>
      %c0_14 = arith.constant 0 : index
      %c0_15 = arith.constant 0 : index
      %33 = vector.load %arg4[%c0_14, %c0_15] : memref<8x512xf32, #tpu.memory_space<vmem>>, vector<8x512xf32>
      tpu.vector_store %arg4[%c0_14, %c0_15], %32 {strides = array<i32>} : memref<8x512xf32, #tpu.memory_space<vmem>>, vector<8x512xf32>,
    } else {
    }
    return
  }
  func.func @transform_0(%arg0: i32, %arg1: i32) -> (i32, i32) {
    %c1_i32 = arith.constant 1 : i32
    %0 = arith.muli %arg0, %c1_i32 : i32
    %1 = arith.addi %0, %arg1 : i32
    %c0_i32 = arith.constant 0 : i32
    %2 = arith.minsi %1, %c0_i32 : i32
    %c0_i32_0 = arith.constant 0 : i32
    %c0_i32_1 = arith.constant 0 : i32
    return %2, %c0_i32_0 : i32, i32
  }
  func.func @transform_1(%arg0: i32, %arg1: i32) -> (i32, i32) {
    %c1_i32 = arith.constant 1 : i32
    %0 = arith.muli %arg0, %c1_i32 : i32
    %1 = arith.addi %0, %arg1 : i32
    %c0_i32 = arith.constant 0 : i32
    %2 = arith.minsi %1, %c0_i32 : i32
    %c0_i32_0 = arith.constant 0 : i32
    %c0_i32_1 = arith.constant 0 : i32
    return %2, %c0_i32_0 : i32, i32
  }
  func.func @transform_2(%arg0: i32, %arg1: i32) -> (i32, i32) {
    %c0_i32 = arith.constant 0 : i32
    %c0_i32_0 = arith.constant 0 : i32
    return %arg0, %c0_i32 : i32, i32
  }
}

</mosaic_0001>

<bundles_post_ra>
// kernel: tpu_custom_call.1
= control target key start
LH: loop header
LB: loop body
LE: loop exit
PB: predicated region body
PF: predicated region fallthrough
CT: control target
= control target key end

     0   :  { %7 = vsyncpa [#allocation3], 0  ;;  %s616_s0 = inlined_call_operand.hbm [shape: f32[1,512], index: 0, kind: input, shape index: {}]   ;;  %s617_s1 = inlined_call_operand.hbm [shape: f32[1,512], index: 1, kind: input, shape index: {}]   ;;  %s618_s2 = inlined_call_operand.hbm [shape: f32[8,512], index: 2, kind: output, shape index: {}]  }
   0x1   :  { %8 = vsyncpa [#allocation6], 0 }
   0x2   :  { %9 = vsyncpa [#allocation4], 0 }
   0x3   :  { %20 = vsyncadd [#allocation3], 448  ;;  %s25_s11 = sshll.u32 %s616_s0, 4  ;;  %s480_s12 = smov [#allocation2]   ;;  %s26_s11 = int_to_ptr.hbm [resolvable:$true] %s25_s11 }
   0x4   :  { %s27_s13 = sshll.u32 %s480_s12, 4  ;;  %s481_s14 = smov 64   ;;  %s28_s13 = int_to_ptr.vmem [resolvable:$true] %s27_s13 }
   0x5   :  { %s482_s15 = smov 4  }
   0x6   :  { %33 = dma.hbm_to_vmem [thread:$0]  %s26_s11, 64, %s28_s13, [#allocation3], %s481_s14, %s481_s14, %s482_s15  }
   0x7   :  { %44 = vsyncadd [#allocation6], 448  ;;  %s49_s18 = sshll.u32 %s617_s1, 4  ;;  %s483_s19 = smov [#allocation5]   ;;  %s50_s18 = int_to_ptr.hbm [resolvable:$true] %s49_s18 }
   0x8   :  { %s51_s20 = sshll.u32 %s483_s19, 4  ;;  %s52_s20 = int_to_ptr.vmem [resolvable:$true] %s51_s20 }
   0x9   :  { %57 = dma.hbm_to_vmem [thread:$0]  %s50_s18, 64, %s52_s20, [#allocation6], %s481_s14, %s481_s14, %s482_s15  }
   0xa   :  { %474 = dma.done.wait [#allocation3], 512  }
   0xb   :  { %475 = vsyncadd [#allocation3], 4294966784 }
   0xc   :  { %476 = dma.done.wait [#allocation6], 512  }
   0xd   :  { %477 = vsyncadd [#allocation6], 4294966784  ;;  %v228_v0 = vlaneseq  ;;  %v484_v2 = vmov 0   ;;  %v507_v8 = vld [vmem:[#allocation5] sm:$0xf]  ;;  %s485_s0 = smov [#allocation7]  }
   0xe   :  { %vm220_vm1 = vcmp.gt.f32.partialorder %v507_v8, 0.0  ;;  %v510_v9 = vld [vmem:[#allocation5 + $0x4] sm:$0xf]  ;;  %v517_v11 = vld [vmem:[#allocation5 + $0x8] sm:$0xf]  ;;  %s362_s1 = sshll.u32 %s485_s0, 4  ;;  %s363_s1 = int_to_ptr.vmem [resolvable:$true] %s362_s1 }
   0xf   :  { %v229_v1 = vshrl.u32 %v228_v0, 7  ;;  %vm221_vm6 = vcmp.gt.f32.partialorder %v510_v9, 0.0  ;;  %vm222_vm9 = vcmp.gt.f32.partialorder %v517_v11, 0.0  ;;  %v527_v14 = vld [vmem:[#allocation5 + $0xc] sm:$0xf]  ;;  %s364_s23 = sshll.u32 %s618_s2, 4  ;;  %s365_s23 = int_to_ptr.hbm [resolvable:$true] %s364_s23 }
  0x10   :  { %vm223_vm11 = vcmp.gt.f32.partialorder %v527_v14, 0.0  ;;  %v537_v17 = vld [vmem:[#allocation5 + $0x10] sm:$0xf]  ;;  %v550_v22 = vld [vmem:[#allocation5 + $0x14] sm:$0xf] }
  0x11   :  { %vm232_vm0 = vcmp.lt.s32.totalorder %v229_v1, 1  ;;  %vm224_vm13 = vcmp.gt.f32.partialorder %v537_v17, 0.0  ;;  %vm225_vm15 = vcmp.gt.f32.partialorder %v550_v22, 0.0  ;;  %v553_v24 = vld [vmem:[#allocation5 + $0x18] sm:$0xf] }
  0x12   :  { %v233_v3 = vsel %vm232_vm0, 1, %v484_v2  ;;  %v560_v27 = vld [vmem:[#allocation5 + $0x1c] sm:$0xf]  ;;  %v86_v32 = vld [vmem:[#allocation2] sm:$0xf] }
  0x13   :  { %v234_v4 = vperm.slane %v233_v3, 0  ;;  %v235_v5 = vperm.slane %v233_v3, 1  ;;  %v236_v6 = vperm.slane %v233_v3, 2  ;;  %v237_v7 = vperm.slane %v233_v3, 3  ;;  %v87_v37 = vld [vmem:[#allocation2 + $0x4] sm:$0xf] }
  0x14   :  { %v238_v20 = vperm.slane %v233_v3, 4  ;;  %v239_v23 = vperm.slane %v233_v3, 5  ;;  %v240_v25 = vperm.slane %v233_v3, 6  ;;  %v241_v30 = vperm.slane %v233_v3, 7  ;;  %v88_v41 = vld [vmem:[#allocation2 + $0x8] sm:$0xf] }
  0x15   :  { %vm242_vm2 = vcmp.ne.s32.totalorder %v234_v4, 0  ;;  %vm243_vm3 = vcmp.ne.s32.totalorder %v235_v5, 0  ;;  %vm244_vm4 = vcmp.ne.s32.totalorder %v236_v6, 0  ;;  %vm245_vm7 = vcmp.ne.s32.totalorder %v237_v7, 0  ;;  %v89_v46 = vld [vmem:[#allocation2 + $0xc] sm:$0xf] }
  0x16   :  { %vm512_vm5 = vmand %vm220_vm1, %vm242_vm2  ;;  %vm246_vm14 = vcmp.ne.s32.totalorder %v238_v20, 0  ;;  %vm247_vm1 = vcmp.ne.s32.totalorder %v239_v23, 0  ;;  %vm226_vm2 = vcmp.gt.f32.partialorder %v553_v24, 0.0  ;;  %v90_v55 = vld [vmem:[#allocation2 + $0x10] sm:$0xf] }
  0x17   :  { %v258_v12 = vsel %vm512_vm5, %v507_v8, 1.0  ;;  %vm522_vm8 = vmand %vm221_vm6, %vm243_vm3  ;;  %vm227_vm6 = vcmp.gt.f32.partialorder %v560_v27, 0.0  ;;  %v91_v56 = vld [vmem:[#allocation2 + $0x14] sm:$0xf]  ;;  %v92_v61 = vld [vmem:[#allocation2 + $0x18] sm:$0xf] }
  0x18   :  { %386 = vlog2.f32 %v258_v12  ;;  %v259_v15 = vsel %vm522_vm8, %v510_v9, 1.0  ;;  %vm532_vm10 = vmand %vm222_vm9, %vm244_vm4  ;;  %vm248_vm4 = vcmp.ne.s32.totalorder %v240_v25, 0  ;;  %vm249_vm9 = vcmp.ne.s32.totalorder %v241_v30, 0 }
  0x19   :  { %388 = vlog2.f32 %v259_v15  ;;  %v260_v18 = vsel %vm532_vm10, %v517_v11, 1.0  ;;  %vm542_vm12 = vmand %vm223_vm11, %vm245_vm7 }
  0x1a   :  { %390 = vlog2.f32 %v260_v18  ;;  %v261_v21 = vsel %vm542_vm12, %v527_v14, 1.0  ;;  %vm555_vm0 = vmand %vm224_vm13, %vm246_vm14 }
  0x1b   :  { %392 = vlog2.f32 %v261_v21  ;;  %v262_v28 = vsel %vm555_vm0, %v537_v17, 1.0  ;;  %vm565_vm3 = vmand %vm225_vm15, %vm247_vm1 }
  0x1c   :  { %394 = vlog2.f32 %v262_v28  ;;  %v263_v33 = vsel %vm565_vm3, %v550_v22, 1.0  ;;  %vm573_vm7 = vmand %vm226_vm2, %vm248_vm4 }
  0x1d   :  { %396 = vlog2.f32 %v263_v33  ;;  %v264_v38 = vsel %vm573_vm7, %v553_v24, 1.0  ;;  %vm582_vm11 = vmand %vm227_vm6, %vm249_vm9 }
  0x1e   :  { %v387_v31 = vpop.eup %386  ;;  %398 = vlog2.f32 %v264_v38  ;;  %v265_v47 = vsel %vm582_vm11, %v560_v27, 1.0 }
  0x1f   :  { %v389_v35 = vpop.eup %388  ;;  %v267_v36 = vmul.f32 0.6931472, %v387_v31  ;;  %400 = vlog2.f32 %v265_v47 }
  0x20   :  { %v391_v39 = vpop.eup %390  ;;  %v269_v40 = vmul.f32 0.6931472, %v389_v35 }
  0x21   :  { %v393_v43 = vpop.eup %392  ;;  %v282_v44 = vsub.f32 %v267_v36, %v86_v32  ;;  %v271_v45 = vmul.f32 0.6931472, %v391_v39 }
  0x22   :  { %v283_v48 = vsub.f32 %v269_v40, %v87_v37  ;;  %v273_v49 = vmul.f32 0.6931472, %v393_v43  ;;  %v395_v52 = vpop.eup %394 }
  0x23   :  { %v290_v50 = vmul.f32 %v282_v44, %v507_v8  ;;  %v284_v51 = vsub.f32 %v271_v45, %v88_v41  ;;  %v397_v57 = vpop.eup %396  ;;  %v275_v60 = vmul.f32 0.6931472, %v395_v52  ;;  %v93_v8 = vld [vmem:[#allocation2 + $0x1c] sm:$0xf] }
  0x24   :  { %v291_v53 = vmul.f32 %v283_v48, %v510_v9  ;;  %v285_v54 = vsub.f32 %v273_v49, %v89_v46  ;;  %v399_v62 = vpop.eup %398  ;;  %v277_v1 = vmul.f32 0.6931472, %v397_v57 }
  0x25   :  { %v298_v58 = vsel %vm512_vm5, %v290_v50, 0.0  ;;  %v292_v59 = vmul.f32 %v284_v51, %v517_v11  ;;  %v286_v3 = vsub.f32 %v275_v60, %v90_v55  ;;  %v279_v4 = vmul.f32 0.6931472, %v399_v62  ;;  %v401_v5 = vpop.eup %400 }
  0x26   :  { %326 = vst [vmem:[#allocation1] ss:$9 sm:$0xff] %v298_v58  ;;  %v299_v63 = vsel %vm522_vm8, %v291_v53, 0.0  ;;  %v293_v0 = vmul.f32 %v285_v54, %v527_v14  ;;  %v287_v7 = vsub.f32 %v277_v1, %v91_v56  ;;  %v281_v11 = vmul.f32 0.6931472, %v401_v5 }
  0x27   :  { %328 = vst [vmem:[#allocation1 + $0x1] ss:$9 sm:$0xff] %v299_v63  ;;  %v300_v2 = vsel %vm532_vm10, %v292_v59, 0.0  ;;  %v294_v9 = vmul.f32 %v286_v3, %v537_v17  ;;  %v288_v10 = vsub.f32 %v279_v4, %v92_v61 }
  0x28   :  { %330 = vst [vmem:[#allocation1 + $0x2] ss:$9 sm:$0xff] %v300_v2  ;;  %v301_v6 = vsel %vm542_vm12, %v293_v0, 0.0  ;;  %v295_v12 = vmul.f32 %v287_v7, %v550_v22  ;;  %v289_v15 = vsub.f32 %v281_v11, %v93_v8 }
  0x29   :  { %332 = vst [vmem:[#allocation1 + $0x3] ss:$9 sm:$0xff] %v301_v6  ;;  %v302_v13 = vsel %vm555_vm0, %v294_v9, 0.0  ;;  %v296_v14 = vmul.f32 %v288_v10, %v553_v24 }
  0x2a   :  { %334 = vst [vmem:[#allocation1 + $0x4] ss:$9 sm:$0xff] %v302_v13  ;;  %v303_v16 = vsel %vm565_vm3, %v295_v12, 0.0  ;;  %v297_v17 = vmul.f32 %v289_v15, %v560_v27 }
  0x2b   :  { %336 = vst [vmem:[#allocation1 + $0x5] ss:$9 sm:$0xff] %v303_v16  ;;  %v304_v18 = vsel %vm573_vm7, %v296_v14, 0.0 }
  0x2c   :  { %338 = vst [vmem:[#allocation1 + $0x6] ss:$9 sm:$0xff] %v304_v18  ;;  %v305_v19 = vsel %vm582_vm11, %v297_v17, 0.0 }
  0x2d   :  { %340 = vst [vmem:[#allocation1 + $0x7] ss:$9 sm:$0xff] %v305_v19 }
  0x34   :  { %v341_v20 = vld [vmem:[#allocation1] sm:$0xff]  ;;  %v342_v21 = vld [vmem:[#allocation1 + $0x9] sm:$0xff]  ;;  %v343_v22 = vld [vmem:[#allocation1 + $0x12] sm:$0xff] }
  0x35   :  { %v344_v23 = vld [vmem:[#allocation1 + $0x1b] sm:$0xff]  ;;  %353 = vst [vmem:[#allocation7] sm:$0xff] %v341_v20 }
  0x36   :  { %354 = vst [vmem:[#allocation7 + $0x8] sm:$0xff] %v342_v21 }
  0x37   :  { %355 = vst [vmem:[#allocation7 + $0x10] sm:$0xff] %v343_v22 }
  0x38   :  { %356 = vst [vmem:[#allocation7 + $0x18] sm:$0xff] %v344_v23 }
  0x39   :  { %367 = dma.vmem_to_hbm [thread:$0]  %s363_s1, 512, %s365_s23, [#allocation4]  }
  0x3a   :  { %478 = dma.done.wait [#allocation4], 512  }
  0x3b   :  { %479 = vsyncadd [#allocation4], 4294966784 }
  0x3c   :  { %372 = vsyncpa [#allocation3], 1 }
  0x3d   :  { %373 = vsyncpa [#allocation6], 1 }
  0x3e   :  { %374 = vsyncpa [#allocation4], 1 }

</bundles_post_ra>
